<compile_context>
chip_gen: v7x
topology: tpu7x:2x2x1
jax: 0.10.0
libtpu: 0.0.40
codegen_flags: <defaults>
</compile_context>

<pallas_src>
import functools
import math

import jax
import jax.numpy as jnp
from jax import lax
from jax.experimental import pallas as pl
from jax.experimental.pallas import tpu as pltpu

_EPS = 1e-12  # F.normalize eps


def _round_up(x, n):
    return ((x + n - 1) // n) * n


def _row_normalize_kernel(x_ref, o_ref):
    """L2-normalize rows (axis=-1) of a (TB, F) tile; emit bf16."""
    x = x_ref[...].astype(jnp.float32)
    inv = lax.rsqrt(jnp.maximum(jnp.sum(x * x, axis=1, keepdims=True),
                                _EPS * _EPS))
    o_ref[...] = (x * inv).astype(o_ref.dtype)


def _col_normalize_kernel(x_ref, o_ref):
    """L2-normalize columns (axis=0) of a (F, TC) tile; emit bf16."""
    x = x_ref[...].astype(jnp.float32)
    inv = lax.rsqrt(jnp.maximum(jnp.sum(x * x, axis=0, keepdims=True),
                                _EPS * _EPS))
    o_ref[...] = (x * inv).astype(o_ref.dtype)


def _arcloss_kernel(d_ref, hn_ref, w_ref, loss_ref, m_sc, l_sc, t_sc, *,
                    s, cosm, sinm, nclass, fuse_wnorm, has_pad_cols):
    c = pl.program_id(1)
    nc = pl.num_programs(1)
    tb = hn_ref.shape[0]
    tc = w_ref.shape[1]

    @pl.when(c == 0)
    def _():
        m_sc[...] = jnp.full_like(m_sc, -1e30)  # running max of s*cos (non-target)
        l_sc[...] = jnp.zeros_like(l_sc)        # running sum of exp(s*cos - max)
        t_sc[...] = jnp.zeros_like(t_sc)        # gathered target cosine

    if fuse_wnorm:
        # Fused column L2-normalization of the raw f32 w tile (nb <= 2 path):
        # rsqrt goes to the EUP slot, then cast to bf16 to feed the MXU.
        w = w_ref[...]
        inv_nrm = lax.rsqrt(
            jnp.maximum(jnp.sum(w * w, axis=0, keepdims=True), _EPS * _EPS))
        w_n = (w * inv_nrm).astype(jnp.bfloat16)
    else:
        w_n = w_ref[...]                        # pre-normalized bf16 tile

    # cos(theta) for this (B tile, C tile): bf16 operands, f32 MXU accumulation.
    coso = jnp.dot(hn_ref[...], w_n, preferred_element_type=jnp.float32)  # [TB,TC]

    labels = d_ref[...]                                           # [TB,1] int32
    # Local iota compared against shifted [TB,1]/scalar values: avoids a
    # [TB,TC] offset add on the hot path.
    local_ids = lax.broadcasted_iota(jnp.int32, (tb, tc), 1)
    is_target = local_ids == (labels - c * tc)                    # [TB,TC]

    # Gather the target cosine (exactly one hit per real row across all C tiles).
    t_sc[...] += jnp.sum(jnp.where(is_target, coso, 0.0), axis=1, keepdims=True)

    # Single combined mask -> one jnp.where.  The pad compare is removed at
    # compile time when C is a tile multiple; otherwise (nclass - c*tc) >= tc
    # on every tile but the last, so the extra compare is trivially all-false
    # there and no runtime branch is required.
    if has_pad_cols:
        masked = is_target | (local_ids >= (nclass - c * tc))
    else:
        masked = is_target
    scores = jnp.where(masked, -jnp.inf, s * coso)

    # Online, max-shifted sum of exp(s*cos) over non-target, non-padded classes.
    m_prev = m_sc[...]
    m_new = jnp.maximum(m_prev, jnp.max(scores, axis=1, keepdims=True))
    l_sc[...] = (l_sc[...] * jnp.exp(m_prev - m_new)
                 + jnp.sum(jnp.exp(scores - m_new), axis=1, keepdims=True))
    m_sc[...] = m_new

    @pl.when(c == nc - 1)
    def _():
        # Margin math only on the [TB,1] gathered target cosine.
        t = t_sc[...]
        sino = jnp.sqrt(jnp.maximum(1.0 - t * t, 0.0))   # clamp rounding ulps
        cosom = t * cosm - sino * sinm                   # cos(theta_target + m)
        # per-sample loss = -log(e / (e + sum_exp)) = log1p(sum_exp * exp(-s*cosom))
        # computed as softplus(z), z = log(sum_exp) - s*cosom (max-shifted form).
        z = m_sc[...] + jnp.log(l_sc[...]) - s * cosom
        loss_ref[...] = jnp.maximum(z, 0.0) + jnp.log(1.0 + jnp.exp(-jnp.abs(z)))
    # TODO(synk): PyTorch's debug `print(cosom)` has no in-kernel equivalent; omitted.


def arc_loss_pallas(h, d, w, m=0.5, s=5.0, *, tb=None, tc=None):
    """Pallas ArcLoss forward.  h: [B, F] float, d: [B] int labels, w: [F, C]."""
    B, F = h.shape
    Fw, C = w.shape
    assert F == Fw

    f_pad = _round_up(F, 128)          # contraction-dim lane alignment

    # --- tile selection ------------------------------------------------------
    # TB: as large as the batch allows (<= 512); multiple of 16 so bf16 blocks
    # stay sublane-clean.  Bigger TB => fewer re-streams of w from HBM.
    if tb is None:
        tb = min(512, _round_up(B, 16))
    tb = max(16, _round_up(int(tb), 16))
    b_pad = _round_up(B, tb)
    nb = b_pad // tb
    # TODO(synk): on v7x with nb == 1 both TensorCores only get work if the C
    # reduction itself is split across cores (per-core partial LSE state +
    # tiny combine epilogue); not implemented here.

    # TC: 512 default; amortizes per-grid-step overhead, issues big HBM DMAs,
    # and fills the 256-wide MXU on v6e/v7x.
    if tc is None:
        tc = min(512, _round_up(C, 128))
    tc = max(128, _round_up(int(tc), 128))
    c_pad = _round_up(C, tc)
    nc = c_pad // tc
    assert c_pad - C < tc              # pad columns live only in the last C tile

    # Fused w normalization streams raw f32 w once per B tile: cheaper HBM-wise
    # than the separate pass (read+write+re-read) whenever nb <= 2.
    fuse_wnorm = nb <= 2

    h_p = jnp.pad(h.astype(jnp.float32), ((0, b_pad - B), (0, f_pad - F)))
    w_p = jnp.pad(w.astype(jnp.float32), ((0, f_pad - F), (0, c_pad - C)))
    d_p = jnp.pad(d.astype(jnp.int32), (0, b_pad - B)).reshape(b_pad, 1)

    # --- VMEM budget: sized to the tiles, capped under v7x's 64 MiB/TC --------
    lane = 128
    w_elt = 4 if fuse_wnorm else 2
    vmem_need = (2 * f_pad * tc * w_elt      # double-buffered w stream
                 + 2 * tb * f_pad * 2        # double-buffered bf16 h_n
                 + 4 * tb * lane * 4         # labels + loss blocks (lane-padded)
                 + 3 * tb * lane * 4         # (m, l, t) scratch accumulators
                 + 6 * tb * tc * 4)          # f32 [TB,TC] temporaries
    vmem_limit = int(min(48 * 2**20, max(24 * 2**20, int(1.5 * vmem_need))))

    # --- L2-normalize h rows once per step (tiny; B x F), emit bf16 -----------
    h_n = pl.pallas_call(
        _row_normalize_kernel,
        out_shape=jax.ShapeDtypeStruct((b_pad, f_pad), jnp.bfloat16),
        grid=(nb,),
        in_specs=[pl.BlockSpec((tb, f_pad), lambda i: (i, 0))],
        out_specs=pl.BlockSpec((tb, f_pad), lambda i: (i, 0)),
        compiler_params=pltpu.CompilerParams(
            dimension_semantics=("parallel",), vmem_limit_bytes=vmem_limit),
    )(h_p)

    # --- w columns: fused into the main kernel (nb <= 2) or hoisted bf16 pass -
    if fuse_wnorm:
        w_in = w_p
    else:
        w_in = pl.pallas_call(
            _col_normalize_kernel,
            out_shape=jax.ShapeDtypeStruct((f_pad, c_pad), jnp.bfloat16),
            grid=(nc,),
            in_specs=[pl.BlockSpec((f_pad, tc), lambda j: (0, j))],
            out_specs=pl.BlockSpec((f_pad, tc), lambda j: (0, j)),
            compiler_params=pltpu.CompilerParams(
                dimension_semantics=("parallel",), vmem_limit_bytes=vmem_limit),
        )(w_p)

    kernel = functools.partial(
        _arcloss_kernel, s=float(s), cosm=math.cos(float(m)),
        sinm=math.sin(float(m)), nclass=C, fuse_wnorm=fuse_wnorm,
        has_pad_cols=(c_pad != C))

    per_sample = pl.pallas_call(
        kernel,
        out_shape=jax.ShapeDtypeStruct((b_pad, 1), jnp.float32),
        grid_spec=pltpu.PrefetchScalarGridSpec(
            num_scalar_prefetch=0,
            grid=(nb, nc),                                     # C reduction innermost
            in_specs=[
                pl.BlockSpec((tb, 1), lambda i, c: (i, 0)),        # labels
                pl.BlockSpec((tb, f_pad), lambda i, c: (i, 0)),    # h_n (bf16, resident per B tile)
                pl.BlockSpec((f_pad, tc), lambda i, c: (0, c)),    # w tile, streamed over C
            ],
            out_specs=pl.BlockSpec((tb, 1), lambda i, c: (i, 0)),
            scratch_shapes=[pltpu.VMEM((tb, 1), jnp.float32),      # running max
                            pltpu.VMEM((tb, 1), jnp.float32),      # running sum
                            pltpu.VMEM((tb, 1), jnp.float32)],     # target cosine
        ),
        compiler_params=pltpu.CompilerParams(
            dimension_semantics=("parallel", "arbitrary"),
            vmem_limit_bytes=vmem_limit),
        cost_estimate=pl.CostEstimate(
            flops=2 * b_pad * f_pad * c_pad,
            transcendentals=b_pad * c_pad,
            bytes_accessed=(nb * f_pad * c_pad * w_elt
                            + b_pad * f_pad * 2 + 8 * b_pad),
        ),
    )(d_p, h_n, w_in)

    # Final mean over the real (un-padded) rows; tiny reduction in plain JAX.
    return jnp.sum(per_sample[:B, 0]) / B


def arc_loss_ref(h, d, w, m=0.5, s=5.0, matmul_dtype=jnp.float32):
    """Pure-JAX reference mirroring the PyTorch forward.

    matmul_dtype=jnp.bfloat16 mirrors the kernel's intentional bf16 MXU feed.
    """
    C = w.shape[1]
    mask = jax.nn.one_hot(d, C, dtype=jnp.float32)
    h_n = h / jnp.maximum(jnp.linalg.norm(h, axis=1, keepdims=True), 1e-12)
    w_n = w / jnp.maximum(jnp.linalg.norm(w, axis=0, keepdims=True), 1e-12)
    h_n = h_n.astype(matmul_dtype).astype(jnp.float32)
    w_n = w_n.astype(matmul_dtype).astype(jnp.float32)
    coso = jnp.dot(h_n, w_n, precision=jax.lax.Precision.HIGHEST)
    sino = jnp.sqrt(jnp.maximum(1.0 - coso ** 2, 0.0))
    cosom = coso * math.cos(m) - sino * math.sin(m)
    exp_cosom = jnp.exp(jnp.sum(cosom * mask, axis=1) * s)
    exp_coso = jnp.exp(coso * s) * (1.0 - mask)
    sum_exp = jnp.sum(exp_coso, axis=1)
    return -jnp.mean(jnp.log(exp_cosom / (exp_cosom + sum_exp)))


def _check(name, h, d, w, m, s, **tile_kw):
    loss = arc_loss_pallas(h, d, w, m=m, s=s, **tile_kw)
    jax.block_until_ready(loss)
    ref_bf16 = arc_loss_ref(h, d, w, m=m, s=s, matmul_dtype=jnp.bfloat16)
    ref_f32 = arc_loss_ref(h, d, w, m=m, s=s, matmul_dtype=jnp.float32)
    assert jnp.isfinite(loss), f"{name}: loss is not finite"
    # Kernel intentionally feeds the MXU with bf16 normalized operands.
    assert jnp.allclose(loss, ref_bf16, rtol=1e-2, atol=1e-2), (name, loss, ref_bf16)
    assert jnp.allclose(loss, ref_f32, rtol=5e-2, atol=5e-2), (name, loss, ref_f32)
    return loss


if __name__ == "__main__":
    m_margin, s_scale = 0.5, 5.0
    key = jax.random.PRNGKey(0)

    # Test 1: module-sized tiny shapes -> fused w-normalization path (nb == 1).
    nfeature, nclass, batch = 32, 16, 8
    k_h, k_w, k_d, key = (*jax.random.split(key, 3), key)
    k_h, k_w, k_d = jax.random.split(key, 3)
    h1 = jax.random.normal(k_h, (batch, nfeature), dtype=jnp.float32)
    w1 = jax.random.normal(k_w, (nfeature, nclass), dtype=jnp.float32)  # stand-in for nn.Parameter
    d1 = jax.random.randint(k_d, (batch,), 0, nclass, dtype=jnp.int32)
    _check("fused_nb1", h1, d1, w1, m_margin, s_scale)

    # Test 2: forced small tiles -> two-pass bf16 w-normalization (nb == 3)
    # with multiple C tiles, padded class columns, and the streaming LSE.
    k_h2, k_w2, k_d2 = jax.random.split(jax.random.PRNGKey(1), 3)
    h2 = jax.random.normal(k_h2, (48, 64), dtype=jnp.float32)
    w2 = jax.random.normal(k_w2, (64, 300), dtype=jnp.float32)
    d2 = jax.random.randint(k_d2, (48,), 0, 300, dtype=jnp.int32)
    _check("two_pass_nb3", h2, d2, w2, m_margin, s_scale, tb=16, tc=128)

    # Test 3: fused path with nb == 2 and multiple C tiles.
    k_h3, k_w3, k_d3 = jax.random.split(jax.random.PRNGKey(2), 3)
    h3 = jax.random.normal(k_h3, (40, 32), dtype=jnp.float32)
    w3 = jax.random.normal(k_w3, (32, 200), dtype=jnp.float32)
    d3 = jax.random.randint(k_d3, (40,), 0, 200, dtype=jnp.int32)
    _check("fused_nb2", h3, d3, w3, m_margin, s_scale, tb=32, tc=128)

    print("KERNEL_OK")
</pallas_src>

<mosaic_0001>
module attributes {stable_mosaic.version = 11 : i64} {
  func.func @_row_normalize_kernel(%arg0: i32, %arg1: memref<16x128xf32, #tpu.memory_space<vmem>>, %arg2: memref<16x128xbf16, #tpu.memory_space<vmem>>) attributes {dimension_semantics = [#tpu.dimension_semantics<parallel>], iteration_bounds = array<i64: 1>, scalar_prefetch = 0 : i64, scratch_operands = 0 : i64, tpu.core_type = #tpu.core_type<tc>, window_params = [{transform_indices = @transform_0, window_bounds = array<i64: 16, 128>}, {transform_indices = @transform_1, window_bounds = array<i64: 16, 128>}]} {
    %c0 = arith.constant 0 : index
    %c0_0 = arith.constant 0 : index
    %0 = vector.load %arg1[%c0, %c0_0] : memref<16x128xf32, #tpu.memory_space<vmem>>, vector<16x128xf32>
    %1 = arith.mulf %0, %0 : vector<16x128xf32>
    %cst = arith.constant dense<0.000000e+00> : vector<16xf32>
    %2 = vector.multi_reduction <add>, %1, %cst [1] : vector<16x128xf32> to vector<16xf32>
    %3 = vector.shape_cast %2 : vector<16xf32> to vector<16x1xf32>
    %cst_1 = arith.constant 1.000000e-24 : f32
    %4 = vector.broadcast %cst_1 : f32 to vector<16x1xf32>
    %5 = arith.maximumf %3, %4 : vector<16x1xf32>
    %6 = math.rsqrt %5 : vector<16x1xf32>
    %7 = vector.broadcast %6 : vector<16x1xf32> to vector<16x128xf32>
    %8 = arith.mulf %0, %7 : vector<16x128xf32>
    %9 = arith.truncf %8 : vector<16x128xf32> to vector<16x128xbf16>
    %c0_2 = arith.constant 0 : index
    %c0_3 = arith.constant 0 : index
    %10 = vector.load %arg2[%c0_2, %c0_3] : memref<16x128xbf16, #tpu.memory_space<vmem>>, vector<16x128xbf16>
    tpu.vector_store %arg2[%c0_2, %c0_3], %9 {strides = array<i32>} : memref<16x128xbf16, #tpu.memory_space<vmem>>, vector<16x128xbf16>,
    return
  }
  func.func @transform_0(%arg0: i32) -> (i32, i32) {
    %c0_i32 = arith.constant 0 : i32
    %c0_i32_0 = arith.constant 0 : i32
    return %arg0, %c0_i32 : i32, i32
  }
  func.func @transform_1(%arg0: i32) -> (i32, i32) {
    %c0_i32 = arith.constant 0 : i32
    %c0_i32_0 = arith.constant 0 : i32
    return %arg0, %c0_i32 : i32, i32
  }
}

</mosaic_0001>

<bundles_post_ra>
// kernel: tpu_custom_call.1
= control target key start
LH: loop header
LB: loop body
LE: loop exit
PB: predicated region body
PF: predicated region fallthrough
CT: control target
= control target key end

     0   :  { %6 = vsyncpa [#allocation3], 0  ;;  %s171_s0 = inlined_call_operand.hbm [shape: f32[16,128], index: 0, kind: input, shape index: {}]   ;;  %s172_s1 = inlined_call_operand.hbm [shape: bf16[16,128], index: 1, kind: output, shape index: {}]  }
   0x1   :  { %7 = vsyncpa [#allocation4], 0  ;;  %s131_s6 = smov [#allocation2]   ;;  %s83_s10 = scalar_lea.hbm %s171_s0, 256 }
   0x2   :  { %s13_s7 = sshll.u32 %s131_s6, 4  ;;  %p84_p0 = scmp.ne.s32.totalorder %s171_s0, %s83_s10  ;;  %s14_s7 = int_to_ptr.vmem [resolvable:$true] %s13_s7 }
   0x3   :  { %p87_p1 = scmp.lt.u32.totalorder %s83_s10, %s171_s0 }
   0x5   :  { %p89_p2 = pnand %p87_p1, %p84_p0 }
   0x7   :  { %92 = shalt.err (!%p89_p2)
}
   0x8   :  { %s93_s15 = scalar_lea.vmem %s14_s7, 256  ;;  %p98_p4 = scmp.lt.s32.totalorder %s14_s7, %s14_s7 }
   0x9   :  { %p94_p3 = scmp.ne.s32.totalorder %s14_s7, %s93_s15  ;;  %p99_p5 = scmp.lt.s32.totalorder %s93_s15, %s93_s15 }
   0xb   :  { %p100_p6 = por %p99_p5, %p98_p4 }
   0xd   :  { %p101_p7 = pnand %p100_p6, %p94_p3 }
   0xf   :  { %104 = shalt.err (!%p101_p7)
}
  0x10   :  { %s132_s16 = smov 128   ;;  %s133_s17 = smov 8  }
  0x11   :  { %19 = dma.hbm_to_vmem [thread:$0]  %s171_s0, 256, %s14_s7, [#allocation3], %s132_s16, %s132_s16, %s133_s17  }
  0x12   :  { %127 = dma.done.wait [#allocation3], 256  }
  0x13   :  { %128 = vsyncadd [#allocation3], 4294967040  ;;  %v23_v0 = vld [vmem:[#allocation2] sm:$0xff]  ;;  %v24_v1 = vld [vmem:[#allocation2 + $0x8] sm:$0xff]  ;;  %s134_s20 = smov [#allocation5]  }
  0x14   :  { %v25_v2 = vmul.f32 %v23_v0, %v23_v0  ;;  %v26_v3 = vmul.f32 %v24_v1, %v24_v1  ;;  %s52_s21 = sshll.u32 %s134_s20, 4  ;;  %s53_s21 = int_to_ptr.vmem [resolvable:$true] %s52_s21 }
  0x15   :  { %s105_s0 = scalar_lea.vmem %s53_s21, 128  ;;  %p110_p9 = scmp.lt.s32.totalorder %s53_s21, %s53_s21 }
  0x16   :  { %27 = vadd.xlane.f32.xlu0 %v25_v2  ;;  %p106_p8 = scmp.ne.s32.totalorder %s53_s21, %s105_s0  ;;  %p111_p10 = scmp.lt.s32.totalorder %s105_s0, %s105_s0 }
  0x18   :  { %p112_p11 = por %p111_p10, %p110_p9 }
  0x1a   :  { %29 = vadd.xlane.f32.xlu0 %v26_v3  ;;  %p113_p12 = pnand %p112_p11, %p106_p8 }
  0xa3   :  { %v28_v4 = vpop.xlane.xlu0 %27 }
  0xa4   :  { %v31_v5 = vmax.f32 %v28_v4, 1e-24 }
  0xa6   :  { %79 = vrsqrt.f32 %v31_v5 }
  0xa7   :  { %v30_v6 = vpop.xlane.xlu0 %29 }
  0xa8   :  { %v32_v7 = vmax.f32 %v30_v6, 1e-24 }
  0xaa   :  { %81 = vrsqrt.f32 %v32_v7 }
  0xb0   :  { %v80_v8 = vpop.eup %79 }
  0xb1   :  { %v35_v10 = vmul.f32 %v80_v8, %v23_v0 }
  0xb4   :  { %v82_v9 = vpop.eup %81 }
  0xb5   :  { %v36_v11 = vmul.f32 %v82_v9, %v24_v1 }
  0xb7   :  { %v71_v12 = vpack.c.bf16 %v36_v11, %v35_v10 }
  0xb9   :  { %72 = vst [vmem:[#allocation5] sm:$0xff] %v71_v12  }
  0xba   :  { %116 = shalt.err (!%p113_p12)
}
  0xbb   :  { %s117_s24 = scalar_lea.hbm %s172_s1, 128 }
  0xbc   :  { %p118_p13 = scmp.ne.s32.totalorder %s172_s1, %s117_s24  ;;  %p121_p0 = scmp.lt.u32.totalorder %s117_s24, %s172_s1 }
  0xbe   :  { %p123_p1 = pnand %p121_p0, %p118_p13 }
  0xc0   :  { %126 = shalt.err (!%p123_p1)
}
  0xc1   :  { %s135_s29 = smov 64   ;;  %s136_s30 = smov 4  }
  0xc2   :  { %58 = dma.vmem_to_hbm [thread:$0]  %s53_s21, 128, %s172_s1, [#allocation4], %s135_s29, %s135_s29, %s136_s30  }
  0xc3   :  { %129 = dma.done.wait [#allocation4], 128  }
  0xc4   :  { %130 = vsyncadd [#allocation4], 4294967168 }
  0xc5   :  { %62 = vsyncpa [#allocation3], 1 }
  0xc6   :  { %63 = vsyncpa [#allocation4], 1 }

</bundles_post_ra>
